<compile_context>
chip_gen: v7x
topology: tpu7x:2x2x1
jax: 0.10.0
libtpu: 0.0.40
codegen_flags: <defaults>
</compile_context>

<pallas_src>
import jax
import jax.numpy as jnp
from jax.experimental import pallas as pl
from jax.experimental.pallas import tpu as pltpu

_LANES = 128
_ROW_ALIGN = 32                 # int8 sublane tiling => block rows % 32 == 0
_DEFAULT_BLOCK_ROWS = 8192      # 4 MiB f32 + 1 MiB int8 per block


def _round_up(x, m):
    return (x + m - 1) // m * m


def _coral_kernel(nvalid_ref, x_ref, lev_ref, out_ref):
    """Per-tile CORAL partial sums over a flat lane-dense layout.

    nvalid_ref: (1,) int32 in SMEM  — number of valid flat elements (= N*K)
    x_ref     : (S, 128) logits tile (flat fold of [N, K]; any float dtype)
    lev_ref   : (S, 128) int8 {0,1} level flags, same flat fold
    out_ref   : (1, 128) per-lane partial loss sum for this tile
    """
    i = pl.program_id(0)
    S, L = x_ref.shape

    x = x_ref[...].astype(jnp.float32)          # bf16 inputs upcast in-kernel
    lev = lev_ref[...].astype(jnp.float32)      # {0.0, 1.0}

    # Numerically stable logsigmoid(x) = min(x, 0) - log1p(exp(-|x|)).
    logpt = jnp.minimum(x, 0.0) - jnp.log1p(jnp.exp(-jnp.abs(x)))
    # logpt*lev + (logpt - x)*(1 - lev) == logpt - x*(1 - lev)
    acc = logpt - x * (1.0 - lev)

    last = pl.num_programs(0) - 1

    @pl.when(i != last)
    def _():
        # Interior tiles contain only valid elements: no mask needed.
        out_ref[...] = jnp.sum(acc, axis=0, keepdims=True)

    @pl.when(i == last)
    def _():
        # Only the last tile can contain wrapper-padded zeros or out-of-bounds
        # garbage (possibly NaN/Inf); the select discards it AFTER the math.
        # flat index is int32: fine while N*K < 2**31 elements.
        row = jax.lax.broadcasted_iota(jnp.int32, (S, L), 0)
        lane = jax.lax.broadcasted_iota(jnp.int32, (S, L), 1)
        flat = (i * S + row) * L + lane
        masked = jnp.where(flat < nvalid_ref[0], acc, 0.0)
        out_ref[...] = jnp.sum(masked, axis=0, keepdims=True)


def coral_loss(y_pred, y_true, *, block_rows=_DEFAULT_BLOCK_ROWS):
    """CORAL loss.

    y_pred: [N, K] float logits (f32 or bf16; upcast to f32 inside the kernel)
    y_true: [N]    int labels in {0, ..., K}
    """
    N, K = y_pred.shape
    n_elem = N * K
    rows = -(-n_elem // _LANES)                         # ceil(N*K / 128)

    S = min(_round_up(block_rows, _ROW_ALIGN), _round_up(rows, _ROW_ALIGN))
    num_tiles = -(-rows // S)

    # Flat lane-dense view (no transpose). int8 level flags: lev[i, j] = j < y_i.
    x_flat = y_pred.reshape(-1)
    lev_flat = (
        (jnp.arange(K, dtype=jnp.int32)[None, :] < y_true.astype(jnp.int32)[:, None])
        .astype(jnp.int8)
        .reshape(-1)
    )
    pad = rows * _LANES - n_elem
    if pad:  # only when N*K is not already a multiple of 128
        x_flat = jnp.pad(x_flat, (0, pad))
        lev_flat = jnp.pad(lev_flat, (0, pad))
    x2 = x_flat.reshape(rows, _LANES)
    lev2 = lev_flat.reshape(rows, _LANES)

    n_valid = jnp.array([n_elem], dtype=jnp.int32)      # scalar-prefetch arg

    grid_spec = pltpu.PrefetchScalarGridSpec(
        num_scalar_prefetch=1,
        grid=(num_tiles,),
        in_specs=[
            pl.BlockSpec((S, _LANES), lambda i, nv: (i, 0)),
            pl.BlockSpec((S, _LANES), lambda i, nv: (i, 0)),
        ],
        out_specs=pl.BlockSpec((1, _LANES), lambda i, nv: (i, 0)),
    )

    partials = pl.pallas_call(
        _coral_kernel,
        out_shape=jax.ShapeDtypeStruct((num_tiles, _LANES), jnp.float32),
        grid_spec=grid_spec,
        compiler_params=pltpu.CompilerParams(
            dimension_semantics=("parallel",),       # v7x: shard tiles over 2 TCs
            vmem_limit_bytes=32 * 1024 * 1024,        # safe on v5e/v6e/v7x
        ),
    )(n_valid, x2, lev2)

    # Final tiny cross-tile reduce + normalize + negate in plain JAX.
    return -(jnp.sum(partials) / jnp.float32(N))


def coral_loss_ref(y_pred, y_true):
    """Pure-JAX reference for sanity checking."""
    levels = jnp.array(
        [[0, 0, 0], [1, 0, 0], [1, 1, 0], [1, 1, 1]], dtype=jnp.float32
    )
    yp = y_pred.astype(jnp.float32)
    lev = levels[y_true]
    logpt = jax.nn.log_sigmoid(yp)
    loss = jnp.sum(logpt * lev + (logpt - yp) * (1.0 - lev), axis=1)
    return -jnp.mean(loss)


if __name__ == "__main__":
    key = jax.random.PRNGKey(0)
    k_pred, k_true = jax.random.split(key)

    # Small primary case (N=8, K=3).
    N, K = 8, 3
    y_pred = jax.random.normal(k_pred, (N, K), dtype=jnp.float32)
    y_true = jax.random.randint(k_true, (N,), 0, 4, dtype=jnp.int32)
    out = jax.block_until_ready(coral_loss(y_pred, y_true))
    ref = coral_loss_ref(y_pred, y_true)
    assert jnp.allclose(out, ref, atol=1e-5, rtol=1e-5), (out, ref)

    # Multi-tile + tail-pad + partial last block: 3*2500 = 7500 -> 59 rows,
    # block_rows=32 -> 2 grid tiles, last one masked.
    k2p, k2t = jax.random.split(jax.random.PRNGKey(1))
    N2 = 2500
    y_pred2 = jax.random.normal(k2p, (N2, K), dtype=jnp.float32)
    y_true2 = jax.random.randint(k2t, (N2,), 0, 4, dtype=jnp.int32)
    out2 = jax.block_until_ready(coral_loss(y_pred2, y_true2, block_rows=32))
    ref2 = coral_loss_ref(y_pred2, y_true2)
    assert jnp.allclose(out2, ref2, atol=1e-5, rtol=1e-5), (out2, ref2)

    # Zero-pad fast path: 3*1024 = 3072 is a multiple of 128 -> no wrapper pad;
    # the single (partial) block relies on in-kernel masking of OOB rows.
    k3p, k3t = jax.random.split(jax.random.PRNGKey(2))
    N3 = 1024
    y_pred3 = jax.random.normal(k3p, (N3, K), dtype=jnp.float32)
    y_true3 = jax.random.randint(k3t, (N3,), 0, 4, dtype=jnp.int32)
    out3 = jax.block_until_ready(coral_loss(y_pred3, y_true3))
    ref3 = coral_loss_ref(y_pred3, y_true3)
    assert jnp.allclose(out3, ref3, atol=1e-5, rtol=1e-5), (out3, ref3)

    # bf16 logit streaming (kernel upcasts internally).
    y_pred_bf16 = y_pred3.astype(jnp.bfloat16)
    out_bf = jax.block_until_ready(coral_loss(y_pred_bf16, y_true3))
    ref_bf = coral_loss_ref(y_pred_bf16.astype(jnp.float32), y_true3)
    assert jnp.allclose(out_bf, ref_bf, atol=1e-5, rtol=1e-5), (out_bf, ref_bf)

    print("KERNEL_OK")
</pallas_src>

<mosaic_0001>
module attributes {stable_mosaic.version = 11 : i64} {
  func.func @_coral_kernel(%arg0: i32, %arg1: memref<1xi32, #tpu.memory_space<smem>>, %arg2: memref<32x128xf32, #tpu.memory_space<vmem>>, %arg3: memref<32x128xi8, #tpu.memory_space<vmem>>, %arg4: memref<1x128xf32, #tpu.memory_space<vmem>>) attributes {dimension_semantics = [#tpu.dimension_semantics<parallel>], iteration_bounds = array<i64: 1>, scalar_prefetch = 1 : i64, scratch_operands = 0 : i64, tpu.core_type = #tpu.core_type<tc>, window_params = [{transform_indices = @transform_0, window_bounds = array<i64: 32, 128>}, {transform_indices = @transform_1, window_bounds = array<i64: 32, 128>}, {transform_indices = @transform_2, window_bounds = array<i64: 1, 128>}]} {
    %c0 = arith.constant 0 : index
    %c0_0 = arith.constant 0 : index
    %0 = vector.load %arg2[%c0, %c0_0] : memref<32x128xf32, #tpu.memory_space<vmem>>, vector<32x128xf32>
    %c0_1 = arith.constant 0 : index
    %c0_2 = arith.constant 0 : index
    %1 = vector.load %arg3[%c0_1, %c0_2] : memref<32x128xi8, #tpu.memory_space<vmem>>, vector<32x128xi8>
    %2 = arith.sitofp %1 : vector<32x128xi8> to vector<32x128xf32>
    %cst = arith.constant 0.000000e+00 : f32
    %3 = vector.broadcast %cst : f32 to vector<32x128xf32>
    %4 = arith.minimumf %0, %3 : vector<32x128xf32>
    %5 = math.absf %0 : vector<32x128xf32>
    %cst_3 = arith.constant 0.000000e+00 : f32
    %6 = vector.broadcast %cst_3 : f32 to vector<32x128xf32>
    %7 = arith.subf %6, %5 : vector<32x128xf32>
    %8 = math.exp %7 : vector<32x128xf32>
    %9 = math.log1p %8 : vector<32x128xf32>
    %10 = arith.subf %4, %9 : vector<32x128xf32>
    %cst_4 = arith.constant 1.000000e+00 : f32
    %11 = vector.broadcast %cst_4 : f32 to vector<32x128xf32>
    %12 = arith.subf %11, %2 : vector<32x128xf32>
    %13 = arith.mulf %0, %12 : vector<32x128xf32>
    %14 = arith.subf %10, %13 : vector<32x128xf32>
    %c0_i32 = arith.constant 0 : i32
    %15 = arith.cmpi ne, %arg0, %c0_i32 : i32
    %16 = arith.extui %15 : i1 to i32
    %c0_i32_5 = arith.constant 0 : i32
    %17 = arith.cmpi ne, %16, %c0_i32_5 : i32
    scf.if %17 {
      %cst_8 = arith.constant dense<0.000000e+00> : vector<128xf32>
      %21 = vector.multi_reduction <add>, %14, %cst_8 [0] : vector<32x128xf32> to vector<128xf32>
      %22 = vector.shape_cast %21 : vector<128xf32> to vector<1x128xf32>
      %c0_9 = arith.constant 0 : index
      %c0_10 = arith.constant 0 : index
      %23 = vector.load %arg4[%c0_9, %c0_10] : memref<1x128xf32, #tpu.memory_space<vmem>>, vector<1x128xf32>
      tpu.vector_store %arg4[%c0_9, %c0_10], %22 {strides = array<i32>} : memref<1x128xf32, #tpu.memory_space<vmem>>, vector<1x128xf32>,
    } else {
    }
    %c0_i32_6 = arith.constant 0 : i32
    %18 = arith.cmpi eq, %arg0, %c0_i32_6 : i32
    %19 = arith.extui %18 : i1 to i32
    %c0_i32_7 = arith.constant 0 : i32
    %20 = arith.cmpi ne, %19, %c0_i32_7 : i32
    scf.if %20 {
      %21 = tpu.iota {dimensions = array<i32: 0>} : vector<32x128xi32>
      %22 = tpu.iota {dimensions = array<i32: 1>} : vector<32x128xi32>
      %c32_i32 = arith.constant 32 : i32
      %23 = arith.muli %arg0, %c32_i32 : i32
      %24 = vector.broadcast %23 : i32 to vector<32x128xi32>
      %25 = arith.addi %24, %21 : vector<32x128xi32>
      %c128_i32 = arith.constant 128 : i32
      %26 = vector.broadcast %c128_i32 : i32 to vector<32x128xi32>
      %27 = arith.muli %25, %26 : vector<32x128xi32>
      %28 = arith.addi %27, %22 : vector<32x128xi32>
      %c0_8 = arith.constant 0 : index
      %29 = memref.load %arg1[%c0_8] : memref<1xi32, #tpu.memory_space<smem>>
      %30 = vector.broadcast %29 : i32 to vector<32x128xi32>
      %31 = arith.cmpi slt, %28, %30 : vector<32x128xi32>
      %cst_9 = arith.constant 0.000000e+00 : f32
      %32 = vector.broadcast %cst_9 : f32 to vector<32x128xf32>
      %33 = arith.select %31, %14, %32 : vector<32x128xi1>, vector<32x128xf32>
      %cst_10 = arith.constant dense<0.000000e+00> : vector<128xf32>
      %34 = vector.multi_reduction <add>, %33, %cst_10 [0] : vector<32x128xf32> to vector<128xf32>
      %35 = vector.shape_cast %34 : vector<128xf32> to vector<1x128xf32>
      %c0_11 = arith.constant 0 : index
      %c0_12 = arith.constant 0 : index
      %36 = vector.load %arg4[%c0_11, %c0_12] : memref<1x128xf32, #tpu.memory_space<vmem>>, vector<1x128xf32>
      tpu.vector_store %arg4[%c0_11, %c0_12], %35 {strides = array<i32>} : memref<1x128xf32, #tpu.memory_space<vmem>>, vector<1x128xf32>,
    } else {
    }
    return
  }
  func.func @transform_0(%arg0: i32, %arg1: memref<1xi32, #tpu.memory_space<smem>>) -> (i32, i32) {
    %c0_i32 = arith.constant 0 : i32
    %c0_i32_0 = arith.constant 0 : i32
    return %arg0, %c0_i32 : i32, i32
  }
  func.func @transform_1(%arg0: i32, %arg1: memref<1xi32, #tpu.memory_space<smem>>) -> (i32, i32) {
    %c0_i32 = arith.constant 0 : i32
    %c0_i32_0 = arith.constant 0 : i32
    return %arg0, %c0_i32 : i32, i32
  }
  func.func @transform_2(%arg0: i32, %arg1: memref<1xi32, #tpu.memory_space<smem>>) -> (i32, i32) {
    %c0_i32 = arith.constant 0 : i32
    %c0_i32_0 = arith.constant 0 : i32
    return %arg0, %c0_i32 : i32, i32
  }
}

</mosaic_0001>

<bundles_post_ra>
// kernel: tpu_custom_call.1
= control target key start
LH: loop header
LB: loop body
LE: loop exit
PB: predicated region body
PF: predicated region fallthrough
CT: control target
= control target key end

     0   :  { %9 = vsyncpa [#allocation5], 0  ;;  %v152_v35 = vlaneseq  ;;  %s374_s0 = inlined_call_operand.<no memory space> [shape: s32[1], index: 0, kind: input, shape index: {}]   ;;  %s375_s1 = inlined_call_operand.vmem [shape: f32[1,128], index: 1, kind: input, shape index: {}]   ;;  %s376_s2 = inlined_call_operand.vmem [shape: s8[1,128], index: 2, kind: input, shape index: {}]   ;;  %s377_s3 = inlined_call_operand.hbm [shape: f32[1,128], index: 3, kind: output, shape index: {}]  }
   0x1   :  { %v272_v0 = vld [vmem:[%s375_s1] sm:$0xff]  ;;  %v277_v1 = vld [vmem:[%s375_s1 + $0x8] sm:$0xff]  ;;  %v282_v2 = vld [vmem:[%s375_s1 + $0x10] sm:$0xff]  ;;  %v321_v40 = vstv %s374_s0  ;;  %s248_s0 = smov [#allocation4]  }
   0x2   :  { %v287_v3 = vld [vmem:[%s375_s1 + $0x18] sm:$0xff]  ;;  %v46_v4 = vand.u32 2147483647, %v272_v0  ;;  %v47_v5 = vand.u32 2147483647, %v277_v1  ;;  %v42_v39 = vmin.f32 %v272_v0, 0.0 }
   0x3   :  { %v48_v6 = vand.u32 2147483647, %v282_v2  ;;  %v49_v7 = vand.u32 2147483647, %v287_v3  ;;  %v18_v16 = vld [vmem:[%s376_s2] sm:$0x1] }
   0x4   :  { %v50_v8 = vsub.f32 0.0, %v46_v4  ;;  %v51_v9 = vsub.f32 0.0, %v47_v5  ;;  %v19_v17 = vld [vmem:[%s376_s2 + $0x1] sm:$0x1]  ;;  %v20_v18 = vld [vmem:[%s376_s2 + $0x2] sm:$0x1]  ;;  %v26_v23 = vunpack.c.0.s8 %v18_v16 }
   0x5   :  { %v52_v10 = vsub.f32 0.0, %v48_v6  ;;  %v53_v11 = vsub.f32 0.0, %v49_v7  ;;  %v21_v19 = vld [vmem:[%s376_s2 + $0x3] sm:$0x1]  ;;  %v22_v20 = vld [vmem:[%s376_s2 + $0x4] sm:$0x1]  ;;  %v27_v24 = vunpack.c.0.s8 %v19_v17  ;;  %v28_v26 = vunpack.c.0.s8 %v20_v18 }
   0x6   :  { %v54_v12 = vmul.f32 1.442695, %v50_v8  ;;  %v56_v13 = vmul.f32 1.442695, %v51_v9  ;;  %v23_v21 = vld [vmem:[%s376_s2 + $0x5] sm:$0x1]  ;;  %v29_v27 = vunpack.c.0.s8 %v21_v19  ;;  %v30_v28 = vunpack.c.0.s8 %v22_v20 }
   0x7   :  { %v58_v14 = vmul.f32 1.442695, %v52_v10  ;;  %v60_v15 = vmul.f32 1.442695, %v53_v11  ;;  %v24_v22 = vld [vmem:[%s376_s2 + $0x6] sm:$0x1]  ;;  %v31_v29 = vunpack.c.0.s8 %v23_v21  ;;  %v34_v32 = vcvt.s32.f32 %v26_v23 }
   0x8   :  { %208 = vpow2.f32 %v54_v12  ;;  %v25_v25 = vld [vmem:[%s376_s2 + $0x7] sm:$0x1]  ;;  %v32_v30 = vunpack.c.0.s8 %v24_v22  ;;  %v35_v33 = vcvt.s32.f32 %v27_v24  ;;  %v36_v34 = vcvt.s32.f32 %v28_v26  ;;  %s199_s2 = sshll.u32 %s248_s0, 4  ;;  %s200_s2 = int_to_ptr.vmem [resolvable:$true] %s199_s2 }
   0x9   :  { %210 = vpow2.f32 %v56_v13  ;;  %v33_v31 = vunpack.c.0.s8 %v25_v25  ;;  %v37_v37 = vcvt.s32.f32 %v29_v27  ;;  %v38_v38 = vcvt.s32.f32 %v30_v28  ;;  %s224_s10 = scalar_lea.vmem %s200_s2, 16  ;;  %s228_s11 = scalar_lea.vmem %s200_s2, 32 }
   0xa   :  { %212 = vpow2.f32 %v58_v14  ;;  %v39_v42 = vcvt.s32.f32 %v31_v29  ;;  %v40_v43 = vcvt.s32.f32 %v32_v30  ;;  %v43_v44 = vmin.f32 %v277_v1, 0.0  ;;  %p225_p0 = scmp.ne.s32.totalorder %s200_s2, %s224_s10  ;;  %p229_p1 = scmp.lt.s32.totalorder %s200_s2, %s200_s2 }
   0xb   :  { %214 = vpow2.f32 %v60_v15  ;;  %v41_v47 = vcvt.s32.f32 %v33_v31  ;;  %v102_v49 = vsub.f32 1.0, %v34_v32  ;;  %v103_v50 = vsub.f32 1.0, %v35_v33  ;;  %p230_p2 = scmp.lt.s32.totalorder %s228_s11, %s224_s10 }
   0xc   :  { %v104_v53 = vsub.f32 1.0, %v36_v34  ;;  %v153_v54 = vshrl.u32 %v152_v35, 7  ;;  %v105_v56 = vsub.f32 1.0, %v37_v37  ;;  %v106_v57 = vsub.f32 1.0, %v38_v38 }
   0xd   :  { %v107_v60 = vsub.f32 1.0, %v39_v42  ;;  %v44_v61 = vmin.f32 %v282_v2, 0.0  ;;  %v45_v62 = vmin.f32 %v287_v3, 0.0  ;;  %v108_v4 = vsub.f32 1.0, %v40_v43  ;;  %p231_p3 = por %p230_p2, %p229_p1 }
   0xe   :  { %v109_v5 = vsub.f32 1.0, %v41_v47  ;;  %v118_v6 = vcombine.low %v102_v49, %v103_v50  ;;  %v154_v7 = vadd.s32 8, %v153_v54  ;;  %v119_v10 = vcombine.low %v104_v53, %v105_v56 }
   0xf   :  { %v155_v11 = vadd.s32 16, %v153_v54  ;;  %v120_v14 = vcombine.low %v106_v57, %v107_v60  ;;  %v156_v15 = vadd.s32 24, %v153_v54  ;;  %v158_v18 = vand.u32 127, %v152_v35  ;;  %p232_p4 = pnand %p231_p3, %p225_p0 }
  0x10   :  { %v165_v19 = vmul.u32 128, %v153_v54  ;;  %v121_v21 = vcombine.low %v108_v4, %v109_v5  ;;  %v126_v22 = vmul.f32 %v118_v6, %v272_v0  ;;  %v166_v23 = vmul.u32 128, %v154_v7 }
  0x11   :  { %v127_v26 = vmul.f32 %v119_v10, %v277_v1  ;;  %v167_v27 = vmul.u32 128, %v155_v11  ;;  %v168_v32 = vmul.u32 128, %v156_v15 }
  0x12   :  { %v209_v36 = vpop.eup %208  ;;  %v169_v37 = vadd.s32 %v165_v19, %v158_v18  ;;  %v129_v57 = vmul.f32 %v121_v21, %v287_v3 }
  0x13   :  { %v211_v41 = vpop.eup %210  ;;  %v62_v45 = vadd.f32 1.0, %v209_v36  ;;  %v65_v55 = vmul.f32 -0.5, %v209_v36  ;;  %v68_v12 = vand.u32 2147483647, %v209_v36  ;;  %v171_v50 = vadd.s32 %v167_v27, %v158_v18 }
  0x14   :  { %v213_v46 = vpop.eup %212  ;;  %v71_v48 = vadd.f32 1.0, %v211_v41  ;;  %v74_v58 = vmul.f32 -0.5, %v211_v41  ;;  %v77_v16 = vand.u32 2147483647, %v211_v41  ;;  %v172_v54 = vadd.s32 %v168_v32, %v158_v18 }
  0x15   :  { %v324_v51 = vpop.eup %214  ;;  %216 = vlog2.f32 %v62_v45  ;;  %v80_v52 = vadd.f32 1.0, %v213_v46  ;;  %v83_v63 = vmul.f32 -0.5, %v213_v46  ;;  %v66_v8 = vadd.f32 1.0, %v65_v55 }
  0x16   :  { %218 = vlog2.f32 %v71_v48  ;;  %v89_v59 = vadd.f32 1.0, %v324_v51  ;;  %v92_v9 = vmul.f32 -0.5, %v324_v51  ;;  %v75_v13 = vadd.f32 1.0, %v74_v58 }
  0x17   :  { %220 = vlog2.f32 %v80_v52  ;;  %v84_v17 = vadd.f32 1.0, %v83_v63  ;;  %v86_v20 = vand.u32 2147483647, %v213_v46  ;;  %v67_v24 = vmul.f32 %v209_v36, %v66_v8 }
  0x18   :  { %222 = vlog2.f32 %v89_v59  ;;  %v93_v25 = vadd.f32 1.0, %v92_v9  ;;  %vm332_vm0 = vcmp.lt.f32.partialorder %v68_v12, 0.0004427343  ;;  %v76_v30 = vmul.f32 %v211_v41, %v75_v13 }
  0x19   :  { %v95_v31 = vand.u32 2147483647, %v324_v51  ;;  %vm337_vm1 = vcmp.lt.f32.partialorder %v77_v16, 0.0004427343  ;;  %v85_v36 = vmul.f32 %v213_v46, %v84_v17  ;;  %vm341_vm2 = vcmp.lt.f32.partialorder %v86_v20, 0.0004427343 }
  0x1a   :  { %v128_v45 = vmul.f32 %v120_v14, %v282_v2  ;;  %v170_v41 = vadd.s32 %v166_v23, %v158_v18  ;;  %v94_v49 = vmul.f32 %v324_v51, %v93_v25  ;;  %vm175_vm4 = vcmp.lt.s32.totalorder %v169_v37, %v321_v40 }
  0x1b   :  { %vm96_vm3 = vcmp.lt.f32.partialorder %v95_v31, 0.0004427343  ;;  %vm177_vm6 = vcmp.lt.s32.totalorder %v171_v50, %v321_v40  ;;  %vm178_vm7 = vcmp.lt.s32.totalorder %v172_v54, %v321_v40 }
  0x1c   :  { %vm176_vm5 = vcmp.lt.s32.totalorder %v170_v41, %v321_v40 }
  0x1f   :  { %v217_v28 = vpop.eup %216 }
  0x20   :  { %v219_v33 = vpop.eup %218  ;;  %v64_v34 = vmul.f32 0.6931472, %v217_v28 }
  0x21   :  { %v221_v38 = vpop.eup %220  ;;  %v73_v42 = vmul.f32 0.6931472, %v219_v33 }
  0x22   :  { %v70_v47 = vsel %vm332_vm0, %v67_v24, %v64_v34  ;;  %v82_v48 = vmul.f32 0.6931472, %v221_v38  ;;  %v223_v52 = vpop.eup %222 }
  0x23   :  { %v79_v46 = vsel %vm337_vm1, %v76_v30, %v73_v42  ;;  %v98_v53 = vsub.f32 %v42_v39, %v70_v47  ;;  %v91_v55 = vmul.f32 0.6931472, %v223_v52 }
  0x24   :  { %v88_v2 = vsel %vm341_vm2, %v85_v36, %v82_v48  ;;  %v99_v56 = vsub.f32 %v43_v44, %v79_v46 }
  0x25   :  { %v100_v51 = vsub.f32 %v44_v61, %v88_v2  ;;  %v130_v58 = vsub.f32 %v98_v53, %v126_v22  ;;  %v97_v59 = vsel %vm96_vm3, %v94_v49, %v91_v55 }
  0x26   :  { %v131_v60 = vsub.f32 %v99_v56, %v127_v26  ;;  %v101_v0 = vsub.f32 %v45_v62, %v97_v59 }
  0x27   :  { %v132_v39 = vsub.f32 %v100_v51, %v128_v45  ;;  %v179_v63 = vsel %vm175_vm4, %v130_v58, 0.0 }
  0x28   :  { %v180_v4 = vsel %vm176_vm5, %v131_v60, 0.0  ;;  %v133_v1 = vsub.f32 %v101_v0, %v129_v57 }
  0x29   :  { %v181_v44 = vsel %vm177_vm6, %v132_v39, 0.0  ;;  %v183_v5 = vadd.f32 %v180_v4, %v179_v63 }
  0x2a   :  { %v182_v6 = vsel %vm178_vm7, %v133_v1, 0.0 }
  0x2b   :  { %v184_v61 = vadd.f32 %v183_v5, %v181_v44 }
  0x2d   :  { %v185_v7 = vadd.f32 %v184_v61, %v182_v6 }
  0x2f   :  { %v186_v3 = vrot.slane %v185_v7, 4 }
  0x31   :  { %v187_v8 = vadd.f32 %v186_v3, %v185_v7 }
  0x33   :  { %v188_v9 = vrot.slane %v187_v8, 2 }
  0x35   :  { %v189_v10 = vadd.f32 %v188_v9, %v187_v8 }
  0x37   :  { %v190_v11 = vrot.slane %v189_v10, 1 }
  0x39   :  { %v191_v12 = vadd.f32 %v190_v11, %v189_v10 }
  0x3b   :  { %192 = vst [vmem:[#allocation4] sm:$0x1] %v191_v12 }
  0x3c   :  { %235 = shalt.err (!%p232_p4)
}
  0x3d   :  { %s236_s14 = scalar_lea.hbm %s377_s3, 16 }
  0x3e   :  { %p237_p5 = scmp.ne.s32.totalorder %s377_s3, %s236_s14  ;;  %p240_p6 = scmp.lt.u32.totalorder %s236_s14, %s377_s3 }
  0x40   :  { %p242_p7 = pnand %p240_p6, %p237_p5 }
  0x42   :  { %245 = shalt.err (!%p242_p7)
}
  0x43   :  { %202 = dma.vmem_to_hbm [thread:$0]  %s200_s2, 16, %s377_s3, [#allocation5]  }
  0x44   :  { %246 = dma.done.wait [#allocation5], 16  }
  0x45   :  { %247 = vsyncadd [#allocation5], 4294967280 }
  0x46   :  { %206 = vsyncpa [#allocation5], 1 }

</bundles_post_ra>
